<compile_context>
chip_gen: v6e
topology: v6e:2x2x1
jax: 0.10.0
libtpu: 0.0.40
codegen_flags: <defaults>
</compile_context>

<pallas_src>
import functools
import math

import jax
import jax.numpy as jnp
from jax.experimental import pallas as pl
from jax.experimental.pallas import tpu as pltpu


# ---------------------------------------------------------------------------
# Tiling helpers
# ---------------------------------------------------------------------------
_M_TILES = (256, 128, 64, 32, 16, 8)
_N_TILES = (512, 256, 128)
_K_TILES = (512, 256, 128)

# Per-call VMEM cap sized for v7x's 64 MiB physical VMEM per TensorCore
# (comfortably inside v5e/v6e's 128 MiB).
_VMEM_LIMIT = 48 * 1024 * 1024


def _pick_tile(dim, candidates):
    for c in candidates:
        if c <= dim and dim % c == 0:
            return c
    return dim  # fall back to a full-extent block (always legal)


def _round_up(x, m):
    return (x + m - 1) // m * m


# ---------------------------------------------------------------------------
# Fused linear (+ bias + optional activation) kernel:  y = act(x @ Wt + b)
# ---------------------------------------------------------------------------
def _linear_kernel(x_ref, w_ref, b_ref, o_ref, acc_ref, *, activation):
    k = pl.program_id(2)

    @pl.when(k == 0)
    def _():
        acc_ref[...] = jnp.zeros_like(acc_ref)

    acc_ref[...] += jnp.dot(x_ref[...], w_ref[...],
                            preferred_element_type=jnp.float32)

    @pl.when(k == pl.num_programs(2) - 1)
    def _():
        out = acc_ref[...] + b_ref[...].astype(jnp.float32)
        if activation == "gelu":
            out = jax.nn.gelu(out)      # tanh-approx gelu -> EUP slot
        elif activation == "tanh":
            out = jnp.tanh(out)
        o_ref[...] = out.astype(o_ref.dtype)


def pallas_linear(x, w_t, b, activation=None):
    """x: [M, K], w_t: [K, N] (pre-transposed nn.Linear weight), b: [N]."""
    M, K = x.shape
    K2, N = w_t.shape
    assert K == K2
    M_pad = _round_up(max(M, 8), 8)          # keep sublanes dense
    if M_pad != M:
        x = jnp.pad(x, ((0, M_pad - M), (0, 0)))

    tm = _pick_tile(M_pad, _M_TILES)
    tn = _pick_tile(N, _N_TILES)
    tk = _pick_tile(K, _K_TILES)
    grid = (M_pad // tm, N // tn, K // tk)

    out = pl.pallas_call(
        functools.partial(_linear_kernel, activation=activation),
        out_shape=jax.ShapeDtypeStruct((M_pad, N), x.dtype),
        grid=grid,
        in_specs=[
            pl.BlockSpec((tm, tk), lambda i, j, k: (i, k)),
            pl.BlockSpec((tk, tn), lambda i, j, k: (k, j)),
            pl.BlockSpec((1, tn), lambda i, j, k: (0, j)),   # bias: ignores k
        ],
        out_specs=pl.BlockSpec((tm, tn), lambda i, j, k: (i, j)),
        scratch_shapes=[pltpu.VMEM((tm, tn), jnp.float32)],
        compiler_params=pltpu.CompilerParams(
            dimension_semantics=("parallel", "parallel", "arbitrary"),
            vmem_limit_bytes=_VMEM_LIMIT),
    )(x, w_t, b.reshape(1, N))
    return out[:M] if M_pad != M else out


# ---------------------------------------------------------------------------
# Fused BertAddNorm kernel:  y = LayerNorm(x @ Wt + b + residual)
# (output dim kept whole so the LN reduction runs in the finalize branch)
# ---------------------------------------------------------------------------
def _linear_add_ln_kernel(x_ref, w_ref, b_ref, r_ref, g_ref, beta_ref,
                          o_ref, acc_ref, *, eps):
    k = pl.program_id(1)

    @pl.when(k == 0)
    def _():
        acc_ref[...] = jnp.zeros_like(acc_ref)

    acc_ref[...] += jnp.dot(x_ref[...], w_ref[...],
                            preferred_element_type=jnp.float32)

    @pl.when(k == pl.num_programs(1) - 1)
    def _():
        v = (acc_ref[...] + b_ref[...].astype(jnp.float32)
             + r_ref[...].astype(jnp.float32))
        mean = jnp.mean(v, axis=-1, keepdims=True)
        var = jnp.mean(jnp.square(v - mean), axis=-1, keepdims=True)
        n = (v - mean) * jax.lax.rsqrt(var + eps)
        o_ref[...] = (n * g_ref[...].astype(jnp.float32)
                      + beta_ref[...].astype(jnp.float32)).astype(o_ref.dtype)


def pallas_linear_add_ln(x, w_t, b, residual, gamma, beta, eps):
    M, K = x.shape
    _, N = w_t.shape
    M_pad = _round_up(max(M, 8), 8)
    if M_pad != M:
        x = jnp.pad(x, ((0, M_pad - M), (0, 0)))
        residual = jnp.pad(residual, ((0, M_pad - M), (0, 0)))

    tm = _pick_tile(M_pad, _M_TILES)
    tk = _pick_tile(K, _K_TILES)
    grid = (M_pad // tm, K // tk)

    out = pl.pallas_call(
        functools.partial(_linear_add_ln_kernel, eps=eps),
        out_shape=jax.ShapeDtypeStruct((M_pad, N), x.dtype),
        grid=grid,
        in_specs=[
            pl.BlockSpec((tm, tk), lambda i, k: (i, k)),
            pl.BlockSpec((tk, N), lambda i, k: (k, 0)),
            pl.BlockSpec((1, N), lambda i, k: (0, 0)),
            pl.BlockSpec((tm, N), lambda i, k: (i, 0)),
            pl.BlockSpec((1, N), lambda i, k: (0, 0)),
            pl.BlockSpec((1, N), lambda i, k: (0, 0)),
        ],
        out_specs=pl.BlockSpec((tm, N), lambda i, k: (i, 0)),
        scratch_shapes=[pltpu.VMEM((tm, N), jnp.float32)],
        compiler_params=pltpu.CompilerParams(
            dimension_semantics=("parallel", "arbitrary"),
            vmem_limit_bytes=_VMEM_LIMIT),
    )(x, w_t, b.reshape(1, N), residual, gamma.reshape(1, N), beta.reshape(1, N))
    return out[:M] if M_pad != M else out


# ---------------------------------------------------------------------------
# Embeddings: fused (word + position + token_type) sum + LayerNorm
# ---------------------------------------------------------------------------
def _embed_ln_kernel(we_ref, pe_ref, te_ref, g_ref, b_ref, o_ref, *, eps):
    v = (we_ref[...].astype(jnp.float32) + pe_ref[...].astype(jnp.float32)
         + te_ref[...].astype(jnp.float32))
    mean = jnp.mean(v, axis=-1, keepdims=True)
    var = jnp.mean(jnp.square(v - mean), axis=-1, keepdims=True)
    n = (v - mean) * jax.lax.rsqrt(var + eps)
    o_ref[...] = (n * g_ref[...].astype(jnp.float32)
                  + b_ref[...].astype(jnp.float32)).astype(o_ref.dtype)


def pallas_embed_ln(we, pe, te, gamma, beta, eps):
    M, H = we.shape
    M_pad = _round_up(max(M, 8), 8)
    if M_pad != M:
        pad = ((0, M_pad - M), (0, 0))
        we, pe, te = jnp.pad(we, pad), jnp.pad(pe, pad), jnp.pad(te, pad)
    tm = _pick_tile(M_pad, _M_TILES)

    out = pl.pallas_call(
        functools.partial(_embed_ln_kernel, eps=eps),
        out_shape=jax.ShapeDtypeStruct((M_pad, H), we.dtype),
        grid=(M_pad // tm,),
        in_specs=[
            pl.BlockSpec((tm, H), lambda i: (i, 0)),
            pl.BlockSpec((tm, H), lambda i: (i, 0)),
            pl.BlockSpec((tm, H), lambda i: (i, 0)),
            pl.BlockSpec((1, H), lambda i: (0, 0)),
            pl.BlockSpec((1, H), lambda i: (0, 0)),
        ],
        out_specs=pl.BlockSpec((tm, H), lambda i: (i, 0)),
        compiler_params=pltpu.CompilerParams(
            dimension_semantics=("parallel",)),
    )(we, pe, te, gamma.reshape(1, H), beta.reshape(1, H))
    return out[:M] if M_pad != M else out


# ---------------------------------------------------------------------------
# Multi-head self-attention (per batch x head, full sequence resident)
# ---------------------------------------------------------------------------
def _attention_kernel(q_ref, k_ref, v_ref, m_ref, o_ref, *, scale):
    q = q_ref[...].astype(jnp.float32)      # (S, D)
    k = k_ref[...].astype(jnp.float32)      # (S, D)
    v = v_ref[...].astype(jnp.float32)      # (S, D)
    # scores = q @ k^T  (contract last dims; no materialized transpose)
    s = jax.lax.dot_general(q, k, (((1,), (1,)), ((), ())),
                            preferred_element_type=jnp.float32)
    s = s * scale + m_ref[...].astype(jnp.float32)   # additive key mask (1, S)
    s = s - jnp.max(s, axis=-1, keepdims=True)
    p = jnp.exp(s)
    p = p / jnp.sum(p, axis=-1, keepdims=True)
    o_ref[...] = jnp.dot(p, v, preferred_element_type=jnp.float32).astype(o_ref.dtype)


def pallas_attention(q, k, v, ext_mask):
    """q,k,v: [B, NH, S, D]; ext_mask: [B, 1, 1, S] additive mask (0 / -1e4)."""
    B, NH, S, D = q.shape
    scale = 1.0 / math.sqrt(D)
    return pl.pallas_call(
        functools.partial(_attention_kernel, scale=scale),
        out_shape=jax.ShapeDtypeStruct((B, NH, S, D), q.dtype),
        grid=(B, NH),
        in_specs=[
            pl.BlockSpec((None, None, S, D), lambda b, h: (b, h, 0, 0)),
            pl.BlockSpec((None, None, S, D), lambda b, h: (b, h, 0, 0)),
            pl.BlockSpec((None, None, S, D), lambda b, h: (b, h, 0, 0)),
            pl.BlockSpec((None, None, 1, S), lambda b, h: (b, 0, 0, 0)),
        ],
        out_specs=pl.BlockSpec((None, None, S, D), lambda b, h: (b, h, 0, 0)),
        compiler_params=pltpu.CompilerParams(
            dimension_semantics=("parallel", "parallel")),
    )(q, k, v, ext_mask)


# ---------------------------------------------------------------------------
# Parameter init (mirrors Bert.init_weights: N(0, 0.02) weights, zero bias,
# LayerNorm gamma=1 / beta=0) and forward pass
# ---------------------------------------------------------------------------
def init_bert_params(key, cfg):
    H = cfg["hidden_size"]
    I = cfg["intermediate_size"]
    keys = iter(jax.random.split(key, 8 + 8 * cfg["num_hidden_layers"]))
    std = 0.02

    def dense(kw, d_in, d_out):
        # stored pre-transposed: [in, out]
        return {"w_t": jax.random.normal(kw, (d_in, d_out), jnp.float32) * std,
                "b": jnp.zeros((d_out,), jnp.float32)}

    params = {
        "word_emb": jax.random.normal(next(keys), (cfg["vocab_size"], H), jnp.float32) * std,
        "pos_emb": jax.random.normal(next(keys), (cfg["max_position_embeddings"], H), jnp.float32) * std,
        "type_emb": jax.random.normal(next(keys), (cfg["type_vocab_size"], H), jnp.float32) * std,
        "emb_ln_g": jnp.ones((H,), jnp.float32),
        "emb_ln_b": jnp.zeros((H,), jnp.float32),
        "pooler": dense(next(keys), H, H),
        "layers": [],
    }
    for _ in range(cfg["num_hidden_layers"]):
        params["layers"].append({
            "q": dense(next(keys), H, H),
            "k": dense(next(keys), H, H),
            "v": dense(next(keys), H, H),
            "attn_out": dense(next(keys), H, H),
            "attn_ln_g": jnp.ones((H,), jnp.float32),
            "attn_ln_b": jnp.zeros((H,), jnp.float32),
            "inter": dense(next(keys), H, I),
            "out": dense(next(keys), I, H),
            "out_ln_g": jnp.ones((H,), jnp.float32),
            "out_ln_b": jnp.zeros((H,), jnp.float32),
        })
    return params


def bert_forward(params, cfg, input_ids, attention_mask=None,
                 token_type_ids=None, position_ids=None):
    B, S = input_ids.shape
    H = cfg["hidden_size"]
    NH = cfg["num_attention_heads"]
    D = H // NH
    eps = cfg["layer_norm_eps"]

    if attention_mask is None:
        attention_mask = jnp.ones_like(input_ids)
    if token_type_ids is None:
        token_type_ids = jnp.zeros_like(input_ids)
    if position_ids is None:
        position_ids = jnp.broadcast_to(
            jnp.arange(S, dtype=jnp.int32)[None, :], (B, S))

    # extended attention mask: [B, 1, 1, S], 0 keep / -10000 masked
    ext_mask = (1.0 - attention_mask.astype(jnp.float32))[:, None, None, :] * -10000.0

    # --- embeddings ---
    # TODO(synk): embedding-table gathers are data-dependent; kept in plain JAX
    # (jnp.take) and fed into the fused sum + LayerNorm Pallas kernel.
    we = jnp.take(params["word_emb"], input_ids, axis=0).reshape(B * S, H)
    pe = jnp.take(params["pos_emb"], position_ids, axis=0).reshape(B * S, H)
    te = jnp.take(params["type_emb"], token_type_ids, axis=0).reshape(B * S, H)
    hidden = pallas_embed_ln(we, pe, te, params["emb_ln_g"], params["emb_ln_b"], eps)
    # TODO(synk): dropout layers are identity at inference and are omitted.

    for layer in params["layers"]:
        x = hidden                                            # [B*S, H]
        q = pallas_linear(x, layer["q"]["w_t"], layer["q"]["b"])
        k = pallas_linear(x, layer["k"]["w_t"], layer["k"]["b"])
        v = pallas_linear(x, layer["v"]["w_t"], layer["v"]["b"])

        def _heads(t):
            return t.reshape(B, S, NH, D).transpose(0, 2, 1, 3)

        ctx = pallas_attention(_heads(q), _heads(k), _heads(v), ext_mask)
        ctx = ctx.transpose(0, 2, 1, 3).reshape(B * S, H)

        # attention output projection + residual + LayerNorm (BertAddNorm)
        attn_out = pallas_linear_add_ln(
            ctx, layer["attn_out"]["w_t"], layer["attn_out"]["b"], x,
            layer["attn_ln_g"], layer["attn_ln_b"], eps)

        # intermediate dense + gelu (fused epilogue)
        inter = pallas_linear(attn_out, layer["inter"]["w_t"], layer["inter"]["b"],
                              activation="gelu")

        # output dense + residual + LayerNorm (BertAddNorm)
        hidden = pallas_linear_add_ln(
            inter, layer["out"]["w_t"], layer["out"]["b"], attn_out,
            layer["out_ln_g"], layer["out_ln_b"], eps)

    sequence_output = hidden.reshape(B, S, H)

    # --- pooler: lane-dense [B, H] CLS slab, fused dense + bias + tanh ---
    cls = sequence_output[:, 0, :]
    pooled_output = pallas_linear(cls, params["pooler"]["w_t"],
                                  params["pooler"]["b"], activation="tanh")
    return sequence_output, pooled_output


# ---------------------------------------------------------------------------
# Pure-JAX reference for a correctness sanity check
# ---------------------------------------------------------------------------
def _ln_ref(x, g, b, eps):
    mean = jnp.mean(x, axis=-1, keepdims=True)
    var = jnp.mean(jnp.square(x - mean), axis=-1, keepdims=True)
    return (x - mean) / jnp.sqrt(var + eps) * g + b


def bert_forward_ref(params, cfg, input_ids):
    B, S = input_ids.shape
    H = cfg["hidden_size"]
    NH = cfg["num_attention_heads"]
    D = H // NH
    eps = cfg["layer_norm_eps"]
    attention_mask = jnp.ones_like(input_ids)
    token_type_ids = jnp.zeros_like(input_ids)
    position_ids = jnp.broadcast_to(jnp.arange(S, dtype=jnp.int32)[None, :], (B, S))
    ext_mask = (1.0 - attention_mask.astype(jnp.float32))[:, None, None, :] * -10000.0

    def lin(t, d):
        return t @ d["w_t"] + d["b"]

    emb = (jnp.take(params["word_emb"], input_ids, axis=0)
           + jnp.take(params["pos_emb"], position_ids, axis=0)
           + jnp.take(params["type_emb"], token_type_ids, axis=0))
    hidden = _ln_ref(emb, params["emb_ln_g"], params["emb_ln_b"], eps)

    for layer in params["layers"]:
        x = hidden
        q = lin(x, layer["q"]).reshape(B, S, NH, D).transpose(0, 2, 1, 3)
        k = lin(x, layer["k"]).reshape(B, S, NH, D).transpose(0, 2, 1, 3)
        v = lin(x, layer["v"]).reshape(B, S, NH, D).transpose(0, 2, 1, 3)
        s = jnp.einsum("bhqd,bhkd->bhqk", q, k) / math.sqrt(D) + ext_mask
        p = jax.nn.softmax(s, axis=-1)
        ctx = jnp.einsum("bhqk,bhkd->bhqd", p, v).transpose(0, 2, 1, 3).reshape(B, S, H)
        attn_out = _ln_ref(lin(ctx, layer["attn_out"]) + x,
                           layer["attn_ln_g"], layer["attn_ln_b"], eps)
        inter = jax.nn.gelu(lin(attn_out, layer["inter"]))
        hidden = _ln_ref(lin(inter, layer["out"]) + attn_out,
                         layer["out_ln_g"], layer["out_ln_b"], eps)

    pooled = jnp.tanh(lin(hidden[:, 0, :], params["pooler"]))
    return hidden, pooled


if __name__ == "__main__":
    cfg = dict(
        vocab_size=100,
        type_vocab_size=2,
        max_position_embeddings=64,
        hidden_size=32,
        num_attention_heads=4,
        num_hidden_layers=2,
        intermediate_size=64,
        layer_norm_eps=3e-12,
    )
    B, S = 2, 8

    key = jax.random.PRNGKey(0)
    k_params, k_ids = jax.random.split(key)
    params = init_bert_params(k_params, cfg)
    input_ids = jax.random.randint(k_ids, (B, S), 0, cfg["vocab_size"], dtype=jnp.int32)

    seq_out, pooled = bert_forward(params, cfg, input_ids)
    jax.block_until_ready((seq_out, pooled))

    # sanity checks vs a pure-JAX reference
    ref_seq, ref_pooled = bert_forward_ref(params, cfg, input_ids)
    assert seq_out.shape == (B, S, cfg["hidden_size"])
    assert pooled.shape == (B, cfg["hidden_size"])
    assert bool(jnp.all(jnp.isfinite(seq_out))) and bool(jnp.all(jnp.isfinite(pooled)))
    assert jnp.allclose(seq_out, ref_seq, atol=2e-2, rtol=2e-2)
    assert jnp.allclose(pooled, ref_pooled, atol=2e-2, rtol=2e-2)

    print("KERNEL_OK")
</pallas_src>

<mosaic_0001>
module attributes {stable_mosaic.version = 11 : i64} {
  func.func @_embed_ln_kernel(%arg0: i32, %arg1: memref<16x32xf32, #tpu.memory_space<vmem>>, %arg2: memref<16x32xf32, #tpu.memory_space<vmem>>, %arg3: memref<16x32xf32, #tpu.memory_space<vmem>>, %arg4: memref<1x32xf32, #tpu.memory_space<vmem>>, %arg5: memref<1x32xf32, #tpu.memory_space<vmem>>, %arg6: memref<16x32xf32, #tpu.memory_space<vmem>>) attributes {dimension_semantics = [#tpu.dimension_semantics<parallel>], iteration_bounds = array<i64: 1>, scalar_prefetch = 0 : i64, scratch_operands = 0 : i64, tpu.core_type = #tpu.core_type<tc>, window_params = [{transform_indices = @transform_0, window_bounds = array<i64: 16, 32>}, {transform_indices = @transform_1, window_bounds = array<i64: 16, 32>}, {transform_indices = @transform_2, window_bounds = array<i64: 16, 32>}, {pipeline_mode = #tpu.pipeline_mode<synchronous>, transform_indices = @transform_3, window_bounds = array<i64: 1, 32>}, {pipeline_mode = #tpu.pipeline_mode<synchronous>, transform_indices = @transform_4, window_bounds = array<i64: 1, 32>}, {transform_indices = @transform_5, window_bounds = array<i64: 16, 32>}]} {
    %c0 = arith.constant 0 : index
    %c0_0 = arith.constant 0 : index
    %0 = vector.load %arg1[%c0, %c0_0] : memref<16x32xf32, #tpu.memory_space<vmem>>, vector<16x32xf32>
    %c0_1 = arith.constant 0 : index
    %c0_2 = arith.constant 0 : index
    %1 = vector.load %arg2[%c0_1, %c0_2] : memref<16x32xf32, #tpu.memory_space<vmem>>, vector<16x32xf32>
    %2 = arith.addf %0, %1 : vector<16x32xf32>
    %c0_3 = arith.constant 0 : index
    %c0_4 = arith.constant 0 : index
    %3 = vector.load %arg3[%c0_3, %c0_4] : memref<16x32xf32, #tpu.memory_space<vmem>>, vector<16x32xf32>
    %4 = arith.addf %2, %3 : vector<16x32xf32>
    %cst = arith.constant dense<0.000000e+00> : vector<16xf32>
    %5 = vector.multi_reduction <add>, %4, %cst [1] : vector<16x32xf32> to vector<16xf32>
    %6 = vector.shape_cast %5 : vector<16xf32> to vector<16x1xf32>
    %cst_5 = arith.constant 3.200000e+01 : f32
    %7 = vector.broadcast %cst_5 : f32 to vector<16x1xf32>
    %8 = arith.divf %6, %7 : vector<16x1xf32>
    %9 = vector.broadcast %8 : vector<16x1xf32> to vector<16x32xf32>
    %10 = arith.subf %4, %9 : vector<16x32xf32>
    %11 = arith.mulf %10, %10 : vector<16x32xf32>
    %cst_6 = arith.constant dense<0.000000e+00> : vector<16xf32>
    %12 = vector.multi_reduction <add>, %11, %cst_6 [1] : vector<16x32xf32> to vector<16xf32>
    %13 = vector.shape_cast %12 : vector<16xf32> to vector<16x1xf32>
    %cst_7 = arith.constant 3.200000e+01 : f32
    %14 = vector.broadcast %cst_7 : f32 to vector<16x1xf32>
    %15 = arith.divf %13, %14 : vector<16x1xf32>
    %16 = vector.broadcast %8 : vector<16x1xf32> to vector<16x32xf32>
    %17 = arith.subf %4, %16 : vector<16x32xf32>
    %cst_8 = arith.constant 3.000000e-12 : f32
    %18 = vector.broadcast %cst_8 : f32 to vector<16x1xf32>
    %19 = arith.addf %15, %18 : vector<16x1xf32>
    %20 = math.rsqrt %19 : vector<16x1xf32>
    %21 = vector.broadcast %20 : vector<16x1xf32> to vector<16x32xf32>
    %22 = arith.mulf %17, %21 : vector<16x32xf32>
    %c0_9 = arith.constant 0 : index
    %c0_10 = arith.constant 0 : index
    %23 = vector.load %arg4[%c0_9, %c0_10] : memref<1x32xf32, #tpu.memory_space<vmem>>, vector<1x32xf32>
    %24 = vector.broadcast %23 : vector<1x32xf32> to vector<16x32xf32>
    %25 = arith.mulf %22, %24 : vector<16x32xf32>
    %c0_11 = arith.constant 0 : index
    %c0_12 = arith.constant 0 : index
    %26 = vector.load %arg5[%c0_11, %c0_12] : memref<1x32xf32, #tpu.memory_space<vmem>>, vector<1x32xf32>
    %27 = vector.broadcast %26 : vector<1x32xf32> to vector<16x32xf32>
    %28 = arith.addf %25, %27 : vector<16x32xf32>
    %c0_13 = arith.constant 0 : index
    %c0_14 = arith.constant 0 : index
    %29 = vector.load %arg6[%c0_13, %c0_14] : memref<16x32xf32, #tpu.memory_space<vmem>>, vector<16x32xf32>
    tpu.vector_store %arg6[%c0_13, %c0_14], %28 {strides = array<i32>} : memref<16x32xf32, #tpu.memory_space<vmem>>, vector<16x32xf32>,
    return
  }
  func.func @transform_0(%arg0: i32) -> (i32, i32) {
    %c0_i32 = arith.constant 0 : i32
    %c0_i32_0 = arith.constant 0 : i32
    return %arg0, %c0_i32 : i32, i32
  }
  func.func @transform_1(%arg0: i32) -> (i32, i32) {
    %c0_i32 = arith.constant 0 : i32
    %c0_i32_0 = arith.constant 0 : i32
    return %arg0, %c0_i32 : i32, i32
  }
  func.func @transform_2(%arg0: i32) -> (i32, i32) {
    %c0_i32 = arith.constant 0 : i32
    %c0_i32_0 = arith.constant 0 : i32
    return %arg0, %c0_i32 : i32, i32
  }
  func.func @transform_3(%arg0: i32) -> (i32, i32) {
    %c0_i32 = arith.constant 0 : i32
    %c0_i32_0 = arith.constant 0 : i32
    %c0_i32_1 = arith.constant 0 : i32
    return %c0_i32, %c0_i32_0 : i32, i32
  }
  func.func @transform_4(%arg0: i32) -> (i32, i32) {
    %c0_i32 = arith.constant 0 : i32
    %c0_i32_0 = arith.constant 0 : i32
    %c0_i32_1 = arith.constant 0 : i32
    return %c0_i32, %c0_i32_0 : i32, i32
  }
  func.func @transform_5(%arg0: i32) -> (i32, i32) {
    %c0_i32 = arith.constant 0 : i32
    %c0_i32_0 = arith.constant 0 : i32
    return %arg0, %c0_i32 : i32, i32
  }
}

</mosaic_0001>

<bundles_post_ra>
// kernel: tpu_custom_call.1
= control target key start
LH: loop header
LB: loop body
LE: loop exit
PB: predicated region body
PF: predicated region fallthrough
CT: control target
= control target key end

     0   :  { %10 = vsyncpa [#allocation3], 0  ;;  %s308_s0 = inlined_call_operand.hbm [shape: f32[16,32], index: 0, kind: input, shape index: {}]   ;;  %s309_s1 = inlined_call_operand.hbm [shape: f32[16,32], index: 1, kind: input, shape index: {}]   ;;  %s310_s2 = inlined_call_operand.hbm [shape: f32[16,32], index: 2, kind: input, shape index: {}]   ;;  %s311_s3 = inlined_call_operand.vmem [shape: f32[1,32], index: 3, kind: input, shape index: {}]   ;;  %s312_s4 = inlined_call_operand.vmem [shape: f32[1,32], index: 4, kind: input, shape index: {}]   ;;  %s313_s5 = inlined_call_operand.hbm [shape: f32[16,32], index: 5, kind: output, shape index: {}]  }
   0x1   :  { %11 = vsyncpa [#allocation6], 0 }
   0x2   :  { %12 = vsyncpa [#allocation4], 0  ;;  %s236_s18 = smov [#allocation5]   ;;  %s237_s20 = smov [#allocation2]  }
   0x3   :  { %s30_s19 = sshll.u32 %s236_s18, 4  ;;  %s18_s21 = sshll.u32 %s237_s20, 4  ;;  %s31_s19 = int_to_ptr.vmem [resolvable:$true] %s30_s19  ;;  %s19_s21 = int_to_ptr.vmem [resolvable:$true] %s18_s21 }
   0x4   :  { %s158_s22 = scalar_lea.vmem %s31_s19, 256  ;;  %p163_p1 = scmp.lt.s32.totalorder %s31_s19, %s31_s19 }
   0x5   :  { %p159_p0 = scmp.ne.s32.totalorder %s31_s19, %s158_s22  ;;  %p164_p2 = scmp.lt.s32.totalorder %s158_s22, %s158_s22 }
   0x7   :  { %p165_p3 = por %p164_p2, %p163_p1 }
   0x9   :  { %p166_p4 = pnand %p165_p3, %p159_p0 }
   0xb   :  { %169 = shalt.err (!%p166_p4)
}
   0xc   :  { %s238_s23 = smov 128   ;;  %s239_s24 = smov 8  }
   0xd   :  { %36 = dma.hbm_to_vmem [thread:$0]  %s309_s1, 256, %s31_s19, [#allocation6], %s238_s23, %s238_s23, %s239_s24  }
   0xe   :  { %s178_s27 = scalar_lea.vmem %s19_s21, 256  ;;  %p183_p6 = scmp.lt.s32.totalorder %s19_s21, %s19_s21 }
   0xf   :  { %p179_p5 = scmp.ne.s32.totalorder %s19_s21, %s178_s27  ;;  %p184_p7 = scmp.lt.s32.totalorder %s178_s27, %s178_s27 }
  0x11   :  { %p185_p8 = por %p184_p7, %p183_p6 }
  0x13   :  { %p186_p9 = pnand %p185_p8, %p179_p5 }
  0x15   :  { %189 = shalt.err (!%p186_p9)
}
  0x16   :  { %24 = dma.hbm_to_vmem [thread:$0]  %s308_s0, 256, %s19_s21, [#allocation3], %s238_s23, %s238_s23, %s239_s24  }
  0x17   :  { %s240_s30 = smov [#allocation7]  }
  0x18   :  { %s42_s6 = sshll.u32 %s240_s30, 4  ;;  %s43_s6 = int_to_ptr.vmem [resolvable:$true] %s42_s6 }
  0x19   :  { %s198_s7 = scalar_lea.vmem %s43_s6, 256  ;;  %p203_p11 = scmp.lt.s32.totalorder %s43_s6, %s43_s6 }
  0x1a   :  { %p199_p10 = scmp.ne.s32.totalorder %s43_s6, %s198_s7  ;;  %p204_p12 = scmp.lt.s32.totalorder %s198_s7, %s198_s7 }
  0x1c   :  { %p205_p13 = por %p204_p12, %p203_p11 }
  0x1e   :  { %p206_p0 = pnand %p205_p13, %p199_p10 }
  0x20   :  { %209 = shalt.err (!%p206_p0)
}
  0x21   :  { %48 = dma.hbm_to_vmem [thread:$0]  %s310_s2, 256, %s43_s6, [#allocation6], %s238_s23, %s238_s23, %s239_s24  }
  0x22   :  { %230 = dma.done.wait [#allocation3], 256  }
  0x23   :  { %231 = vsyncadd [#allocation3], 4294967040 }
  0x24   :  { %232 = dma.done.wait [#allocation6], 512  }
  0x25   :  { %233 = vsyncadd [#allocation6], 4294966784  ;;  %v62_v0 = vld [vmem:[#allocation2] sm:$0xff]  ;;  %v64_v1 = vld [vmem:[#allocation5] sm:$0xff]  ;;  %vm72_vm0 = vcmask 261120   ;;  %s241_s11 = smov [#allocation8]  }
  0x26   :  { %v68_v2 = vld [vmem:[#allocation7] sm:$0xff]  ;;  %v66_v3 = vadd.f32 %v64_v1, %v62_v0  ;;  %v63_v4 = vld [vmem:[#allocation2 + $0x8] sm:$0xff]  ;;  %v65_v5 = vld [vmem:[#allocation5 + $0x8] sm:$0xff]  ;;  %s125_s12 = sshll.u32 %s241_s11, 4  ;;  %s126_s12 = int_to_ptr.vmem [resolvable:$true] %s125_s12 }
  0x27   :  { %v69_v6 = vld [vmem:[#allocation7 + $0x8] sm:$0xff]  ;;  %v67_v7 = vadd.f32 %v65_v5, %v63_v4  ;;  %v138_v29 = vld [vmem:[%s311_s3] ss:$0 sm:$0xff]  ;;  %s210_s13 = scalar_lea.vmem %s126_s12, 256  ;;  %p215_p2 = scmp.lt.s32.totalorder %s126_s12, %s126_s12 }
  0x28   :  { %v70_v8 = vadd.f32 %v68_v2, %v66_v3  ;;  %v139_v31 = vld [vmem:[%s312_s4] ss:$0 sm:$0xff]  ;;  %p211_p1 = scmp.ne.s32.totalorder %s126_s12, %s210_s13  ;;  %p216_p3 = scmp.lt.s32.totalorder %s210_s13, %s210_s13 }
  0x29   :  { %v71_v9 = vadd.f32 %v69_v6, %v67_v7 }
  0x2a   :  { %v73_v10 = vsel %vm72_vm0, %v70_v8, 0.0  ;;  %p217_p4 = por %p216_p3, %p215_p2 }
  0x2b   :  { %74 = vadd.xlane.f32.xlu0 %v73_v10  ;;  %v76_v11 = vsel %vm72_vm0, %v71_v9, 0.0 }
  0x2c   :  { %p218_p5 = pnand %p217_p4, %p211_p1 }
  0x2f   :  { %77 = vadd.xlane.f32.xlu0 %v76_v11 }
  0xb4   :  { %v75_v12 = vpop.xlane.xlu0 %74 }
  0xb5   :  { %v80_v13 = vmul.f32 0.03125, %v75_v12 }
  0xb7   :  { %v82_v14 = vsub.f32 %v70_v8, %v80_v13 }
  0xb8   :  { %v78_v15 = vpop.xlane.xlu0 %77 }
  0xb9   :  { %v81_v16 = vmul.f32 0.03125, %v78_v15  ;;  %v84_v17 = vmul.f32 %v82_v14, %v82_v14 }
  0xbb   :  { %v83_v18 = vsub.f32 %v71_v9, %v81_v16  ;;  %v86_v19 = vsel %vm72_vm0, %v84_v17, 0.0 }
  0xbc   :  { %87 = vadd.xlane.f32.xlu1 %v86_v19 }
  0xbd   :  { %v85_v20 = vmul.f32 %v83_v18, %v83_v18 }
  0xbf   :  { %v89_v21 = vsel %vm72_vm0, %v85_v20, 0.0 }
  0xc0   :  { %90 = vadd.xlane.f32.xlu1 %v89_v21 }
 0x145   :  { %v88_v22 = vpop.xlane.xlu1 %87 }
 0x146   :  { %v92_v23 = vmul.f32 0.03125, %v88_v22 }
 0x148   :  { %v94_v24 = vadd.f32 3e-12, %v92_v23 }
 0x149   :  { %v91_v25 = vpop.xlane.xlu1 %90 }
 0x14a   :  { %146 = vrsqrt.f32 %v94_v24  ;;  %v93_v26 = vmul.f32 0.03125, %v91_v25 }
 0x14c   :  { %v95_v27 = vadd.f32 3e-12, %v93_v26 }
 0x14e   :  { %148 = vrsqrt.f32 %v95_v27 }
 0x157   :  { %v147_v28 = vpop.eup %146 }
 0x158   :  { %v98_v30 = vmul.f32 %v147_v28, %v82_v14 }
 0x15a   :  { %v107_v32 = vmul.f32 %v138_v29, %v98_v30 }
 0x15b   :  { %v149_v33 = vpop.eup %148 }
 0x15c   :  { %v99_v34 = vmul.f32 %v149_v33, %v83_v18  ;;  %v116_v35 = vadd.f32 %v139_v31, %v107_v32 }
 0x15e   :  { %v108_v36 = vmul.f32 %v138_v29, %v99_v34  ;;  %118 = vst.msk [vmem:[#allocation8] sm:$0xff] %vm72_vm0, %v116_v35 }
 0x160   :  { %v117_v37 = vadd.f32 %v139_v31, %v108_v36 }
 0x162   :  { %119 = vst.msk [vmem:[#allocation8 + $0x8] sm:$0xff] %vm72_vm0, %v117_v37 }
 0x163   :  { %221 = shalt.err (!%p218_p5)
}
 0x164   :  { %131 = dma.vmem_to_hbm [thread:$0]  %s126_s12, 256, %s313_s5, [#allocation4], %s238_s23, %s238_s23, %s239_s24  }
 0x165   :  { %234 = dma.done.wait [#allocation4], 256  }
 0x166   :  { %235 = vsyncadd [#allocation4], 4294967040 }
 0x167   :  { %135 = vsyncpa [#allocation3], 1 }
 0x168   :  { %136 = vsyncpa [#allocation6], 1 }
 0x169   :  { %137 = vsyncpa [#allocation4], 1 }

</bundles_post_ra>
